<compile_context>
chip_gen: v5e
topology: v5e:2x2
jax: 0.10.0
libtpu: 0.0.40
codegen_flags: <defaults>
</compile_context>

<pallas_src>
import functools

import jax
import jax.numpy as jnp
import numpy as np
from jax.experimental import pallas as pl
from jax.experimental.pallas import tpu as pltpu


def _round_up(x, m):
    return ((x + m - 1) // m) * m


def film_siren_kernel(x_ref, wt_ref, b_ref, gamma_ref, beta_ref, o_ref, *,
                      w_0, epilogue_dtype):
    # x_ref:     (TN, D_in)      input dtype (batch dim squeezed)
    # wt_ref:    (D_in, D_out)   bf16 (weight pre-transposed, resident)
    # b_ref:     (1, D_out)      f32  (resident)
    # gamma_ref: (1, D_out)      f32  (batch dim squeezed)
    # beta_ref:  (1, D_out)      f32
    # o_ref:     (TN, D_out)     out dtype
    gamma = gamma_ref[...]
    beta = beta_ref[...]
    bias = b_ref[...]

    # Fold w_0 and the bias into per-step (1, D_out) FiLM vectors — tiny work,
    # done once per grid step, not per row.
    g = (w_0 * gamma).astype(epilogue_dtype)              # (1, D_out)
    c = (w_0 * (gamma * bias + beta)).astype(epilogue_dtype)

    # Linear layer on the MXU: cast activations/weights to bf16 in-kernel
    # (saves a wrapper HBM pass), accumulate in f32.
    y = jnp.dot(x_ref[...].astype(jnp.bfloat16),
                wt_ref[...].astype(jnp.bfloat16),
                preferred_element_type=jnp.float32).astype(epilogue_dtype)

    # FiLM + Siren: one vmul, one vadd, one sin per element; single cast at
    # the store.
    o_ref[...] = jnp.sin(g * y + c).astype(o_ref.dtype)


def prepare_film_siren_params(weight, bias):
    """One-time parameter layout prep (hoisted out of the per-call wrapper).

    weight: (D_out, D_in) -> W.T (D_in, D_out) bf16
    bias:   (D_out,)      -> (1, D_out) f32
    """
    wt = jnp.asarray(weight).T.astype(jnp.bfloat16)
    b2 = jnp.asarray(bias).reshape(1, -1).astype(jnp.float32)
    return wt, b2


def film_siren(x, wt, bias2d, gamma, beta, *, w_0=30.0, out_dtype=None,
               epilogue_dtype=jnp.float32, tile_n=1024):
    """FilmSiren forward.

    x:       (B, N, D_in)   activations (f32 or bf16)
    wt:      (D_in, D_out)  pre-transposed weight (bf16 preferred)
    bias2d:  (1, D_out)     f32
    gamma:   (B, 1, D_out)  f32 FiLM scale
    beta:    (B, 1, D_out)  f32 FiLM shift
    Returns (B, N, D_out) in `out_dtype` (default: x.dtype).
    Pass out_dtype=jnp.bfloat16 when this feeds another bf16 SIREN layer.
    """
    B, N, D_in = x.shape
    D_in_w, D_out = wt.shape
    assert D_in_w == D_in, (wt.shape, x.shape)
    out_dtype = x.dtype if out_dtype is None else jnp.dtype(out_dtype)

    # Points-axis tile: multiple of 8 (or the whole N); Pallas masks the
    # partial last tile, so no N padding / slicing in the wrapper.
    TN = min(_round_up(int(tile_n), 8), _round_up(N, 8))

    def vmem_estimate(tn):
        x_tile = tn * D_in * x.dtype.itemsize
        o_tile = tn * D_out * jnp.dtype(out_dtype).itemsize
        w_res = D_in * D_out * jnp.dtype(wt.dtype).itemsize
        vecs = 4 * max(D_out, 128) * 4  # bias / gamma / beta rows (padded)
        return 2 * (x_tile + o_tile + w_res + vecs)  # double-buffered

    # Keep the working set comfortably under v7x's 32 MiB scoped default
    # (64 MiB/TC physical); no-op on v5e/v6e sizes.
    VMEM_BUDGET = 14 << 20
    while TN > 8 and vmem_estimate(TN) > VMEM_BUDGET:
        TN = max(8, _round_up(TN // 2, 8))
    grid_n = pl.cdiv(N, TN)
    vmem_limit = int(min(32 << 20, max(2 * vmem_estimate(TN), 16 << 20)))

    kernel = functools.partial(
        film_siren_kernel, w_0=float(w_0),
        epilogue_dtype=jnp.dtype(epilogue_dtype))

    out = pl.pallas_call(
        kernel,
        out_shape=jax.ShapeDtypeStruct((B, N, D_out), out_dtype),
        grid_spec=pltpu.PrefetchScalarGridSpec(
            num_scalar_prefetch=0,
            grid=(B, grid_n),
            in_specs=[
                pl.BlockSpec((pl.Squeezed(), TN, D_in),
                             lambda b, n: (b, n, 0)),                 # x tile
                pl.BlockSpec((D_in, D_out), lambda b, n: (0, 0)),     # W.T
                pl.BlockSpec((1, D_out), lambda b, n: (0, 0)),        # bias
                pl.BlockSpec((pl.Squeezed(), 1, D_out),
                             lambda b, n: (b, 0, 0)),                 # gamma
                pl.BlockSpec((pl.Squeezed(), 1, D_out),
                             lambda b, n: (b, 0, 0)),                 # beta
            ],
            out_specs=pl.BlockSpec((pl.Squeezed(), TN, D_out),
                                   lambda b, n: (b, n, 0)),
        ),
        compiler_params=pltpu.CompilerParams(
            dimension_semantics=("parallel", "parallel"),
            vmem_limit_bytes=vmem_limit,
        ),
    )(x, wt, bias2d, gamma, beta)

    return out


def init_film_siren_params(key, input_dim, output_dim, c=6, w_0=30,
                           is_first_layer=False):
    """Deterministic re-implementation of FilmSiren.reset_parameters()."""
    kw, kb = jax.random.split(key)
    if is_first_layer:
        weight_range = 1.0 / input_dim
    else:
        weight_range = np.sqrt(c / input_dim) / w_0
    bias_range = np.sqrt(1.0 / input_dim)
    weight = jax.random.uniform(
        kw, (output_dim, input_dim), jnp.float32, -weight_range, weight_range)
    bias = jax.random.uniform(
        kb, (output_dim,), jnp.float32, -bias_range, bias_range)
    return weight, bias


if __name__ == "__main__":
    # Small shapes consistent with the module: batch=2, points=8,
    # input_dim=32, output_dim=32.
    B, N, D_in, D_out = 2, 8, 32, 32
    w_0 = 30.0

    key = jax.random.PRNGKey(0)
    k_params, k_x, k_g, k_b = jax.random.split(key, 4)

    weight, bias = init_film_siren_params(
        k_params, D_in, D_out, c=6, w_0=w_0, is_first_layer=False)
    wt, bias2d = prepare_film_siren_params(weight, bias)   # one-time prep

    x = jax.random.normal(k_x, (B, N, D_in), jnp.float32)
    gamma = jax.random.normal(k_g, (B, 1, D_out), jnp.float32)
    beta = jax.random.normal(k_b, (B, 1, D_out), jnp.float32)

    # Default: output dtype == input dtype (PyTorch parity).
    out_f32 = jax.block_until_ready(
        film_siren(x, wt, bias2d, gamma, beta, w_0=w_0))
    # Recommended when feeding the next bf16 SIREN layer: bf16 output.
    out_bf16 = jax.block_until_ready(
        film_siren(x, wt, bias2d, gamma, beta, w_0=w_0,
                   out_dtype=jnp.bfloat16))

    # Reference matching the kernel's numerics: bf16-rounded matmul inputs,
    # f32 accumulation, f32 FiLM + sin.  (The only deviation from the pure
    # f32 PyTorch forward is the bf16 cast of x and W for the MXU.)
    xr = x.astype(jnp.bfloat16).astype(jnp.float32)
    wr = weight.astype(jnp.bfloat16).astype(jnp.float32)
    ref = jnp.sin(w_0 * (gamma * (jnp.einsum("bnd,od->bno", xr, wr,
                                             preferred_element_type=jnp.float32)
                                  + bias) + beta))
    np.testing.assert_allclose(np.asarray(out_f32), np.asarray(ref),
                               rtol=2e-3, atol=2e-3)
    np.testing.assert_allclose(np.asarray(out_bf16.astype(jnp.float32)),
                               np.asarray(ref), rtol=2e-2, atol=2e-2)

    print("KERNEL_OK")
</pallas_src>

<mosaic_0001>
module attributes {stable_mosaic.version = 11 : i64} {
  func.func @film_siren_kernel(%arg0: i32, %arg1: i32, %arg2: memref<1x8x32xf32, #tpu.memory_space<vmem>>, %arg3: memref<32x32xbf16, #tpu.memory_space<vmem>>, %arg4: memref<1x32xf32, #tpu.memory_space<vmem>>, %arg5: memref<1x1x32xf32, #tpu.memory_space<vmem>>, %arg6: memref<1x1x32xf32, #tpu.memory_space<vmem>>, %arg7: memref<1x8x32xf32, #tpu.memory_space<vmem>>) attributes {dimension_semantics = [#tpu.dimension_semantics<parallel>, #tpu.dimension_semantics<parallel>], iteration_bounds = array<i64: 2, 1>, scalar_prefetch = 0 : i64, scratch_operands = 0 : i64, tpu.core_type = #tpu.core_type<tc>, window_params = [{transform_indices = @transform_0, window_bounds = array<i64: 1, 8, 32>}, {pipeline_mode = #tpu.pipeline_mode<synchronous>, transform_indices = @transform_1, window_bounds = array<i64: 32, 32>}, {pipeline_mode = #tpu.pipeline_mode<synchronous>, transform_indices = @transform_2, window_bounds = array<i64: 1, 32>}, {transform_indices = @transform_3, window_bounds = array<i64: 1, 1, 32>}, {transform_indices = @transform_4, window_bounds = array<i64: 1, 1, 32>}, {transform_indices = @transform_5, window_bounds = array<i64: 1, 8, 32>}]} {
    %c0 = arith.constant 0 : index
    %c0_0 = arith.constant 0 : index
    %c0_1 = arith.constant 0 : index
    %0 = vector.load %arg5[%c0, %c0_0, %c0_1] : memref<1x1x32xf32, #tpu.memory_space<vmem>>, vector<1x1x32xf32>
    %1 = vector.shape_cast %0 : vector<1x1x32xf32> to vector<1x32xf32>
    %c0_2 = arith.constant 0 : index
    %c0_3 = arith.constant 0 : index
    %c0_4 = arith.constant 0 : index
    %2 = vector.load %arg6[%c0_2, %c0_3, %c0_4] : memref<1x1x32xf32, #tpu.memory_space<vmem>>, vector<1x1x32xf32>
    %3 = vector.shape_cast %2 : vector<1x1x32xf32> to vector<1x32xf32>
    %c0_5 = arith.constant 0 : index
    %c0_6 = arith.constant 0 : index
    %4 = vector.load %arg4[%c0_5, %c0_6] : memref<1x32xf32, #tpu.memory_space<vmem>>, vector<1x32xf32>
    %cst = arith.constant 3.000000e+01 : f32
    %5 = vector.broadcast %cst : f32 to vector<1x32xf32>
    %6 = arith.mulf %5, %1 : vector<1x32xf32>
    %7 = arith.mulf %1, %4 : vector<1x32xf32>
    %8 = arith.addf %7, %3 : vector<1x32xf32>
    %cst_7 = arith.constant 3.000000e+01 : f32
    %9 = vector.broadcast %cst_7 : f32 to vector<1x32xf32>
    %10 = arith.mulf %9, %8 : vector<1x32xf32>
    %c0_8 = arith.constant 0 : index
    %c0_9 = arith.constant 0 : index
    %c0_10 = arith.constant 0 : index
    %11 = vector.load %arg2[%c0_8, %c0_9, %c0_10] : memref<1x8x32xf32, #tpu.memory_space<vmem>>, vector<1x8x32xf32>
    %12 = vector.shape_cast %11 : vector<1x8x32xf32> to vector<8x32xf32>
    %13 = arith.truncf %12 : vector<8x32xf32> to vector<8x32xbf16>
    %c0_11 = arith.constant 0 : index
    %c0_12 = arith.constant 0 : index
    %14 = vector.load %arg3[%c0_11, %c0_12] : memref<32x32xbf16, #tpu.memory_space<vmem>>, vector<32x32xbf16>
    %cst_13 = arith.constant dense<0.000000e+00> : vector<8x32xf32>
    %15 = tpu.matmul %13, %14, %cst_13 {dimension_numbers = #tpu.dot_dimension_numbers<[1], [0], [0], [1], [0, 0, 1, 1], [], []>} : vector<8x32xbf16>, vector<32x32xbf16>, vector<8x32xf32> -> vector<8x32xf32>
    %16 = vector.broadcast %6 : vector<1x32xf32> to vector<8x32xf32>
    %17 = arith.mulf %16, %15 : vector<8x32xf32>
    %18 = vector.broadcast %10 : vector<1x32xf32> to vector<8x32xf32>
    %19 = arith.addf %17, %18 : vector<8x32xf32>
    %20 = math.sin %19 : vector<8x32xf32>
    %c0_14 = arith.constant 0 : index
    %c0_15 = arith.constant 0 : index
    %c0_16 = arith.constant 0 : index
    %21 = vector.load %arg7[%c0_14, %c0_15, %c0_16] : memref<1x8x32xf32, #tpu.memory_space<vmem>>, vector<1x8x32xf32>
    %22 = vector.shape_cast %21 : vector<1x8x32xf32> to vector<8x32xf32>
    %23 = vector.shape_cast %20 : vector<8x32xf32> to vector<1x8x32xf32>
    tpu.vector_store %arg7[%c0_14, %c0_15, %c0_16], %23 {strides = array<i32>} : memref<1x8x32xf32, #tpu.memory_space<vmem>>, vector<1x8x32xf32>,
    return
  }
  func.func @transform_0(%arg0: i32, %arg1: i32) -> (i32, i32, i32) {
    %c0_i32 = arith.constant 0 : i32
    %c0_i32_0 = arith.constant 0 : i32
    return %arg0, %arg1, %c0_i32 : i32, i32, i32
  }
  func.func @transform_1(%arg0: i32, %arg1: i32) -> (i32, i32) {
    %c0_i32 = arith.constant 0 : i32
    %c0_i32_0 = arith.constant 0 : i32
    %c0_i32_1 = arith.constant 0 : i32
    return %c0_i32, %c0_i32_0 : i32, i32
  }
  func.func @transform_2(%arg0: i32, %arg1: i32) -> (i32, i32) {
    %c0_i32 = arith.constant 0 : i32
    %c0_i32_0 = arith.constant 0 : i32
    %c0_i32_1 = arith.constant 0 : i32
    return %c0_i32, %c0_i32_0 : i32, i32
  }
  func.func @transform_3(%arg0: i32, %arg1: i32) -> (i32, i32, i32) {
    %c0_i32 = arith.constant 0 : i32
    %c0_i32_0 = arith.constant 0 : i32
    %c0_i32_1 = arith.constant 0 : i32
    return %arg0, %c0_i32, %c0_i32_0 : i32, i32, i32
  }
  func.func @transform_4(%arg0: i32, %arg1: i32) -> (i32, i32, i32) {
    %c0_i32 = arith.constant 0 : i32
    %c0_i32_0 = arith.constant 0 : i32
    %c0_i32_1 = arith.constant 0 : i32
    return %arg0, %c0_i32, %c0_i32_0 : i32, i32, i32
  }
  func.func @transform_5(%arg0: i32, %arg1: i32) -> (i32, i32, i32) {
    %c0_i32 = arith.constant 0 : i32
    %c0_i32_0 = arith.constant 0 : i32
    return %arg0, %arg1, %c0_i32 : i32, i32, i32
  }
}

</mosaic_0001>

<bundles_post_ra>
// kernel: tpu_custom_call.1
= control target key start
LH: loop header
LB: loop body
LE: loop exit
PB: predicated region body
PF: predicated region fallthrough
CT: control target
= control target key end

     0   :  { %s1298_s0 = inlined_call_operand.hbm [shape: f32[2,8,32], index: 0, kind: input, shape index: {}]   ;;  %s1299_s1 = inlined_call_operand.hbm [shape: bf16[32,32], index: 1, kind: input, shape index: {}]   ;;  %s1300_s2 = inlined_call_operand.hbm [shape: f32[1,32], index: 2, kind: input, shape index: {}]   ;;  %s1301_s3 = inlined_call_operand.vmem [shape: f32[2,1,32], index: 3, kind: input, shape index: {}]   ;;  %s1302_s4 = inlined_call_operand.hbm [shape: f32[2,1,32], index: 4, kind: input, shape index: {}]   ;;  %s1303_s5 = inlined_call_operand.hbm [shape: f32[2,8,32], index: 5, kind: output, shape index: {}]  }
   0x1   :  { %1306 = sst [smem:[#allocation18_spill]] %s1299_s1 }
   0x2   :  { %1307 = sst [smem:[#allocation19_spill]] %s1300_s2 }
   0x3   :  { %10 = vsyncpa [#allocation3], 0 }
   0x4   :  { %12 = vsyncpa [#allocation3 + $0x1], 0 }
   0x5   :  { %13 = vsyncpa [#allocation6], 0 }
   0x6   :  { %14 = vsyncpa [#allocation9], 0 }
   0x7   :  { %16 = vsyncpa [#allocation9 + $0x1], 0 }
   0x8   :  { %17 = vsyncpa [#allocation4], 0 }
   0x9   :  { %19 = vsyncpa [#allocation4 + $0x1], 0  ;;  %s1071_s18 = smov 0   ;;  %s1073_s19 = smov 0  }
   0xa   :  { %s1075_s20 = smov 0   ;;  %s1077_s21 = smov 0  }
   0xb   :  { %s1079_s22 = smov 0   ;;  %s1081_s23 = smov 0  }
   0xc LB: > { %1308 = sst [smem:[#allocation15_spill]] %s1016_s20  ;;  %s690_s24 = sadd.s32 4294967295, %s1028_s23   ;;  %s1028_s23 = sphi %s1081_s23, %s25_s23   ;;  %s1024_s22 = sphi %s1079_s22, %s1325_s22   ;;  %s1020_s21 = sphi %s1077_s21, %s1324_s21   ;;  %s1016_s20 = sphi %s1075_s20, %s1320_s20   ;;  %s1012_s19 = sphi %s1073_s19, %s1323_s19   ;;  %s1008_s18 = sphi %s1071_s18, %s1322_s18  }
   0xd   : > { %p692_p0 = scmp.ge.s32.totalorder %s1028_s23, 1  ;;  %p1105_p1 = scmp.eq.s32.totalorder %s690_s24, 0 }
   0xe   : > { %p192_p2 = scmp.lt.s32.totalorder %s1028_s23, 3  ;;  %s1310_s1 = sld [smem:[#allocation18_spill]] }
   0xf   : > { %s1030_s30 = smov [#allocation5]   ;;  %p695_p6 = scmp.ge.s32.totalorder %s1028_s23, 2 }
  0x10   : > { %p1113_p3 = pnand %p692_p0, %p192_p2  ;;  %s205_s6 = sshll.u32 %s1030_s30, 4  ;;  %s206_s6 = int_to_ptr.vmem [resolvable:$true] %s205_s6 }
  0x11   : > { %s1312_s2 = sld [smem:[#allocation19_spill]]  ;;  %s1031_s10 = smov 64  }
  0x12   : > { %p735_p4 = pneg %p1113_p3  ;;  %s1032_s11 = smov 4  }
  0x13   : > { %s1033_s12 = smov [#allocation7]   ;;  %s691_s14 = sadd.s32 4294967294, %s1028_s23  }
  0x14   : > { %s203_s28 = sshll.u32 %s1310_s1, 4  ;;  %p736_p5 = pnand %p735_p4, %p1105_p1  ;;  %s204_s28 = int_to_ptr.hbm [resolvable:$true] %s203_s28 }
  0x15   : > { %s220_s13 = sshll.u32 %s1033_s12, 4  ;;  %s37_s15 = sadd.s32 1, %s1024_s22  ;;  %s221_s13 = int_to_ptr.vmem [resolvable:$true] %s220_s13 }
  0x16   : > { %738 = dma.hbm_to_vmem [thread:$0]  (!%p736_p5), %s204_s28, 256, %s206_s6, [#allocation6], %s1031_s10, %s1031_s10, %s1032_s11  }
  0x17   : > { %s218_s9 = sshll.u32 %s1312_s2, 4  ;;  %p39_p7 = scmp.ge.s32.totalorder %s37_s15, 2  ;;  %s219_s9 = int_to_ptr.hbm [resolvable:$true] %s218_s9 }
  0x18   : > { %741 = dma.hbm_to_vmem [thread:$0]  (!%p736_p5), %s219_s9, 16, %s221_s13, [#allocation6]  }
  0x19   : > { %s46_s16 = sadd.s32 1, %s1016_s20  ;;  %p53_p8 = scmp.ne.s32.totalorder %s1016_s20, %s1012_s19 }
  0x1a   : > { %p54_p9 = scmp.eq.s32.totalorder %s1028_s23, 0  ;;  %s1327_s15 = smov (%p39_p7, %s37_s15), 0 }
  0x1b   : > { %1313 = sst [smem:[#allocation16_spill]] %s1327_s15  ;;  %p59_p11 = scmp.ne.s32.totalorder %s1012_s19, %s1008_s18 }
  0x1c   : > { %p1133_p10 = por %p54_p9, %p53_p8  ;;  %s41_s26 = ssub.s32 %s1024_s22, %s1327_s15 }
  0x1d   : > { %p179_p12 = scmp.eq.s32.totalorder %s690_s24, 1  ;;  %p44_p13 = scmp.eq.s32.totalorder %s41_s26, 0 }
  0x1e   : > { %p1145_p0 = por %p1105_p1, %p59_p11  ;;  %p185_p4 = scmp.eq.s32.totalorder %s691_s14, 1 }
  0x1f   : > { %p1149_p2 = por %p179_p12, %p53_p8  ;;  %p755_p7 = scmp.lt.s32.totalorder %s1028_s23, 2 }
  0x20   : > { %s1154_s30 = scalar_select %p44_p13, %s1016_s20, %s46_s16  }
  0x21   : > { %p1156_p5 = por %p185_p4, %p59_p11  ;;  %s231_s24 = sand.u32 1, %s1016_s20  }
  0x22   : > { %1317 = sst [smem:[#allocation17_spill]] %s1154_s30  ;;  %s697_s7 = sshll.u32 %s1024_s22, 3 }
  0x23   : > { %s696_s8 = sshll.u32 %s231_s24, 3  ;;  %s240_s11 = scalar_lea.hbm %s1298_s0, %s697_s7 }
  0x24   : > { %s242_s12 = sshll.u32 %s240_s11, 4  ;;  %s235_s13 = scalar_lea.vmem [#allocation2], %s696_s8  ;;  %s243_s12 = int_to_ptr.hbm [resolvable:$true] %s242_s12 }
  0x25   : > { %s244_s26 = sshll.u32 %s235_s13, 4  ;;  %p743_p8 = pnand %p755_p7, %p1133_p10  ;;  %s245_s26 = int_to_ptr.vmem [resolvable:$true] %s244_s26 }
  0x26   : > { %s263_s1 = scalar_lea.hbm %s1302_s4, %s1024_s22  ;;  %s232_s15 = scalar_lea.sflag [#allocation3], %s231_s24 }
  0x27   : > { %s265_s2 = sshll.u32 %s263_s1, 4  ;;  %s260_s30 = scalar_lea.vmem [#allocation8], %s231_s24  ;;  %s266_s2 = int_to_ptr.hbm [resolvable:$true] %s265_s2 }
  0x28   : > { %745 = dma.hbm_to_vmem [thread:$0]  (!%p743_p8), %s243_s12, 128, %s245_s26, %s232_s15  }
  0x29   : > { %s267_s20 = sshll.u32 %s260_s30, 4  ;;  %s258_s9 = scalar_lea.sflag [#allocation9], %s231_s24  ;;  %s268_s20 = int_to_ptr.vmem [resolvable:$true] %s267_s20 }
  0x2a   : > { %748 = dma.hbm_to_vmem [thread:$0]  (!%p743_p8), %s266_s2, 16, %s268_s20, %s258_s9  }
  0x2b   : > { %276 = sbr.rel (%p1113_p3) target bundleno = 290 (0x122), region = 40  ;;  %s1175_s17 = sand.u32 (!%p1113_p3), 1, %s1012_s19  }
  0x2c   : > { %s699_s7 = sshll.u32 (!%p1113_p3), %s1175_s17, 3  ;;  %s279_s1 = scalar_lea.sflag (!%p1113_p3), [#allocation3], %s1175_s17 }
  0x2d   : > { %s282_s15 = scalar_lea.vmem (!%p1113_p3), [#allocation2], %s699_s7 }
  0x30   : > { %991 = dma.done.wait (%p1145_p0), %s279_s1, 128  }
  0x31   : > { %993 = vsyncadd (%p1145_p0), %s279_s1, 4294967168 }
  0x32   : > { %995 = dma.done.wait (%p1105_p1), [#allocation6], 272  }
  0x33   : > { %997 = vsyncadd (%p1105_p1), [#allocation6], 4294967024  ;;  %s299_s2 = scalar_lea.sflag [#allocation9], %s1175_s17  ;;  %s301_s20 = scalar_lea.vmem [#allocation8], %s1175_s17 }
  0x34   : > { %999 = dma.done.wait (%p1145_p0), %s299_s2, 16  }
  0x35   : > { %1001 = vsyncadd (%p1145_p0), %s299_s2, 4294967280  ;;  %v720_v0 = vld [vmem:[#allocation5 + $0x8] sm:$0xff]  ;;  %v719_v1 = vld [vmem:[#allocation5] sm:$0xff]  ;;  %vm365_vm0 = vcmask 261120   ;;  %p336_p1 = scmp.lt.s32.totalorder %s1020_s21, 1  ;;  %s716_s27 = sshll.u32 %s1020_s21, 3 }
  0x36   : > { %375 = vmatpush.bf16.msra.mxu0 %v720_v0  ;;  %v347_v2 = vld [vmem:[%s282_s15] sm:$0xff]  ;;  %v1034_v28 = vmov 683565275   ;;  %v1035_v30 = vmov 2475754826   ;;  %s558_s11 = scalar_lea.hbm %s1303_s5, %s716_s27  ;;  %s335_s12 = scalar_lea.vmem [#allocation10], %s699_s7 }
  0x37   : > { %v348_v3 = vpack.c.bf16 %v347_v2, %v347_v2  ;;  %s337_s25 = scalar_select %p336_p1, %s1020_s21, 1  ;;  %v342_v5 = vld [vmem:[#allocation7] sm:$0x1]  ;;  %v1036_v33 = vmov 2131351028  }
  0x38   : > { %v341_v7 = vld [vmem:[%s301_s20] sm:$0x1]  ;;  %v1037_v36 = vmov 2102212464   ;;  %v1038_v39 = vmov 920167782  }
  0x39   : > { %s338_s24 = scalar_lea.vmem %s1301_s3, %s337_s25  ;;  %v1039_v42 = vmov 1326507024   ;;  %s560_s13 = sshll.u32 %s335_s12, 4  ;;  %s561_s13 = int_to_ptr.vmem [resolvable:$true] %s560_s13 }
  0x3a   : > { %376 = vmatpush.bf16.msra.mxu0 %v719_v1  ;;  %v340_v4 = vld [vmem:[%s338_s24] sm:$0x1]  ;;  %s562_s26 = sshll.u32 %s558_s11, 4  ;;  %s547_s21 = scalar_lea.sflag [#allocation4], %s1175_s17  ;;  %s563_s26 = int_to_ptr.hbm [resolvable:$true] %s562_s26 }
  0x3b   : > { %v344_v6 = vmul.f32 %v342_v5, %v340_v4  ;;  %v343_v9 = vmul.f32 30.0, %v340_v4  ;;  %s952_s14 = sshra.s32 %s563_s26, 4  ;;  %s958_s1 = scalar_lea.hbm %s1303_s5, 16  ;;  %s953_s14 = int_to_ptr.hbm [resolvable:$true] %s952_s14 }
  0x3c   : > { %s954_s16 = scalar_lea.hbm %s953_s14, 8  ;;  %p959_p11 = scmp.lt.s32.totalorder %s953_s14, %s1303_s5 }
  0x3d   : > { %711 = vmatmul.msk.bf16.vlgmr.msra.gmra.mxu0 %vm365_vm0, %v348_v3  ;;  %v345_v8 = vadd.f32 %v344_v6, %v341_v7  ;;  %v383_v11 = vperm.slane %v343_v9, 0  ;;  %p955_p3 = scmp.ne.s32.totalorder %s953_s14, %s954_s16  ;;  %p960_p12 = scmp.lt.s32.totalorder %s958_s1, %s954_s16 }
  0x3f   : > { %v346_v10 = vmul.f32 30.0, %v345_v8  ;;  %p956_p9 = pnand %p955_p3, %p1149_p2  ;;  %p961_p13 = por %p960_p12, %p959_p11 }
  0x41   : > { %v387_v12 = vperm.slane %v346_v10, 0  ;;  %p957_p10 = pneg %p956_p9 }
  0x43   : > { %p962_p0 = pnand %p961_p13, %p957_p10 }
  0xba   : > { %v378_v13 = vpop.f32.mrf.mxu0 }
  0xbb   : > { %v385_v14 = vmul.f32 %v383_v11, %v378_v13 }
  0xbd   : > { %v1201_v15 = vadd.f32 %v387_v12, %v385_v14  ;;  %v1040_v12 = vmov 0  }
  0xbf   : > { %v393_v16 = vand.u32 2139095040, %v1201_v15  ;;  %v390_v20 = vand.u32 2147483647, %v1201_v15  ;;  %vm392_vm13 = vcmp.lt.s32.totalorder %v1201_v15, 0 }
  0xc1   : > { %v394_v17 = vshrl.u32 %v393_v16, 23  ;;  %v397_v22 = vand.u32 8388607, %v390_v20  ;;  %vm391_vm14 = vcmp.le.f32.partialorder %v390_v20, 0.7853982 }
  0xc2   : > { %v380_v18 = vpop.f32.mrf.mxu0 }
  0xc3   : > { %v712_v19 = vadd.s32 4294967169, %v394_v17  ;;  %v398_v26 = vor.u32 8388608, %v397_v22 }
  0xc5   : > { %v400_v21 = vadd.s32 1, %v712_v19  ;;  %v1218_v49 = vshll.u32 %v398_v26, 8 }
  0xc7   : > { %vm401_vm1 = vcmp.gt.s32.totalorder %v400_v21, 0  ;;  %v439_v58 = vand.u32 65535, %v1218_v49  ;;  %v440_v59 = vshrl.u32 %v1218_v49, 16 }
  0xc8   : > { %v402_v23 = vsel %vm401_vm1, %v400_v21, 0 }
  0xc9   : > { %v404_v24 = vand.u32 31, %v402_v23  ;;  %v1209_v27 = vshrl.u32 %v402_v23, 5 }
  0xcb   : > { %v1207_v25 = vsub.s32 32, %v404_v24  ;;  %v407_v29 = vshll.u32 %v1034_v28, %v404_v24  ;;  %v410_v31 = vshll.u32 %v1035_v30, %v404_v24  ;;  %v413_v35 = vshll.u32 %v1036_v33, %v404_v24 }
  0xcc   : > { %v416_v38 = vshll.u32 %v1037_v36, %v404_v24  ;;  %v419_v41 = vshll.u32 %v1038_v39, %v404_v24  ;;  %vm422_vm2 = vcmp.lt.s32.totalorder %v1209_v27, 1  ;;  %vm425_vm3 = vcmp.lt.s32.totalorder %v1209_v27, 4 }
  0xcd   : > { %v408_v32 = vshrl.u32 %v1035_v30, %v1207_v25  ;;  %v411_v34 = vshrl.u32 %v1036_v33, %v1207_v25  ;;  %v414_v37 = vshrl.u32 %v1037_v36, %v1207_v25  ;;  %v417_v40 = vshrl.u32 %v1038_v39, %v1207_v25 }
  0xce   : > { %v420_v43 = vshrl.u32 %v1039_v42, %v1207_v25  ;;  %vm424_vm4 = vcmp.lt.s32.totalorder %v1209_v27, 3  ;;  %vm423_vm5 = vcmp.lt.s32.totalorder %v1209_v27, 2  ;;  %v406_v23 = vshrl.u32 %v1034_v28, %v1207_v25 }
  0xcf   : > { %v409_v44 = vor.u32 %v408_v32, %v407_v29  ;;  %v412_v45 = vor.u32 %v411_v34, %v410_v31  ;;  %v415_v46 = vor.u32 %v414_v37, %v413_v35  ;;  %v418_v47 = vor.u32 %v417_v40, %v416_v38 }
  0xd0   : > { %v421_v48 = vor.u32 %v420_v43, %v419_v41 }
  0xd1   : > { %v430_v50 = vsel %vm422_vm2, %v409_v44, %v412_v45  ;;  %v434_v51 = vsel %vm422_vm2, %v412_v45, %v415_v46  ;;  %v431_v52 = vsel %vm425_vm3, %v418_v47, 920167782  ;;  %v427_v19 = vsel %vm425_vm3, %v415_v46, 2102212464 }
  0xd2   : > { %v435_v53 = vsel %vm425_vm3, %v421_v48, 1326507024  ;;  %v432_v54 = vsel %vm424_vm4, %v415_v46, %v431_v52  ;;  %v426_v32 = vsel %vm422_vm2, %v406_v23, %v409_v44  ;;  %v428_v33 = vsel %vm424_vm4, %v412_v45, %v427_v19 }
  0xd3   : > { %v436_v55 = vsel %vm424_vm4, %v418_v47, %v435_v53  ;;  %v433_v56 = vsel %vm423_vm5, %v430_v50, %v432_v54  ;;  %v429_v25 = vsel %vm423_vm5, %v426_v32, %v428_v33  ;;  %vm533_vm3 = vweird.f32 %v1201_v15 }
  0xd4   : > { %v437_v57 = vsel %vm423_vm5, %v434_v51, %v436_v55  ;;  %v463_v62 = vand.u32 65535, %v433_v56  ;;  %v464_v63 = vshrl.u32 %v433_v56, 16  ;;  %v483_v41 = vmul.u32 %v1218_v49, %v429_v25 }
  0xd5   : > { %v441_v60 = vand.u32 65535, %v437_v57  ;;  %v442_v61 = vshrl.u32 %v437_v57, 16 }
  0xd6   : > { %v466_v2 = vmul.u32 %v464_v63, %v439_v58  ;;  %v467_v3 = vmul.u32 %v463_v62, %v440_v59  ;;  %v465_v7 = vmul.u32 %v463_v62, %v439_v58  ;;  %v468_v11 = vmul.u32 %v464_v63, %v440_v59 }
  0xd7   : > { %v444_v0 = vmul.u32 %v442_v61, %v439_v58  ;;  %v445_v1 = vmul.u32 %v441_v60, %v440_v59  ;;  %v443_v4 = vmul.u32 %v441_v60, %v439_v58  ;;  %v446_v6 = vmul.u32 %v442_v61, %v440_v59 }
  0xd8   : > { %v469_v8 = vshll.u32 %v466_v2, 16  ;;  %v471_v14 = vshll.u32 %v467_v3, 16  ;;  %v470_v30 = vshrl.u32 %v466_v2, 16  ;;  %v472_v36 = vshrl.u32 %v467_v3, 16 }
  0xd9   : > { %v447_v5 = vshll.u32 %v444_v0, 16  ;;  %v449_v9 = vshll.u32 %v445_v1, 16  ;;  %v448_v24 = vshrl.u32 %v444_v0, 16  ;;  %v450_v34 = vshrl.u32 %v445_v1, 16 }
  0xda   : > { %vm473_vm7 = vc.u32 %v465_v7, %v469_v8  ;;  %v475_v16 = vadd.s32 %v469_v8, %v465_v7 }
  0xdb   : > { %vm451_vm6 = vc.u32 %v443_v4, %v447_v5  ;;  %v453_v10 = vadd.s32 %v447_v5, %v443_v4  ;;  %v474_v18 = vsel %vm473_vm7, 1, %v1040_v12 }
  0xdc   : > { %v452_v13 = vsel %vm451_vm6, 1, %v1040_v12  ;;  %v476_v22 = vadd.s32 %v474_v18, %v468_v11  ;;  %vm477_vm9 = vc.u32 %v475_v16, %v471_v14  ;;  %v479_v39 = vadd.s32 %v475_v16, %v471_v14 }
  0xdd   : > { %v454_v17 = vadd.s32 %v452_v13, %v446_v6  ;;  %vm455_vm8 = vc.u32 %v453_v10, %v449_v9  ;;  %v478_v29 = vsel %vm477_vm9, 1, %v1040_v12 }
  0xde   : > { %v456_v21 = vsel %vm455_vm8, 1, %v1040_v12  ;;  %v480_v31 = vadd.s32 %v478_v29, %v476_v22 }
  0xdf   : > { %v458_v26 = vadd.s32 %v456_v21, %v454_v17 }
  0xe0   : > { %v481_v37 = vadd.s32 %v480_v31, %v470_v30 }
  0xe1   : > { %v459_v35 = vadd.s32 %v458_v26, %v448_v24 }
  0xe2   : > { %v482_v28 = vadd.s32 %v481_v37, %v472_v36 }
  0xe3   : > { %v460_v38 = vadd.s32 %v459_v35, %v450_v34 }
  0xe4   : > { %v486_v40 = vadd.s32 1, %v482_v28 }
  0xe5   : > { %vm485_vm10 = vc.u32 %v460_v38, %v479_v39  ;;  %v484_v27 = vadd.s32 %v479_v39, %v460_v38 }
  0xe6   : > { %v487_v42 = vsel %vm485_vm10, %v486_v40, %v482_v28 }
  0xe7   : > { %v488_v43 = vadd.s32 %v487_v42, %v483_v41 }
  0xe9   : > { %v489_v44 = vadd.s32 536870912, %v488_v43 }
  0xeb   : > { %v490_v46 = vshrl.u32 %v489_v44, 30 }
  0xed   : > { %v491_v47 = vshll.u32 %v490_v46, 30  ;;  %v514_v2 = vsub.s32 4, %v490_v46 }
  0xef   : > { %v492_v45 = vsub.s32 %v488_v43, %v491_v47  ;;  %v515_v7 = vsel %vm392_vm13, %v514_v2, %v490_v46 }
  0xf0   : > { %v517_v10 = vsel %vm391_vm14, 0, %v515_v7 }
  0xf1   : > { %vm493_vm11 = vcmp.lt.s32.totalorder %v492_v45, 0  ;;  %v494_v48 = vsub.s32 0, %v492_v45  ;;  %v534_v16 = vadd.s32 3, %v517_v10 }
  0xf3   : > { %v495_v50 = vsel %vm493_vm11, %v494_v48, %v492_v45  ;;  %v535_v21 = vand.u32 3, %v534_v16 }
  0xf4   : > { %v496_v51 = vclz %v495_v50 }
  0xf5   : > { %vm537_vm15 = vcmp.eq.s32.totalorder %v535_v21, 0  ;;  %vm540_vm1 = vcmp.eq.s32.totalorder %v535_v21, 2  ;;  %vm536_vm2 = vcmp.lt.s32.totalorder %v535_v21, 2 }
  0xf6   : > { %v713_v52 = vadd.s32 4294967294, %v496_v51 }
  0xf8   : > { %vm714_vm12 = vcmp.lt.s32.totalorder %v713_v52, 0 }
  0xf9   : > { %v499_v53 = vsel %vm714_vm12, 0, %v713_v52 }
  0xfa   : > { %v500_v54 = vsub.s32 32, %v499_v53  ;;  %v504_v55 = vsub.s32 4294967266, %v499_v53  ;;  %v501_v56 = vshll.u32 %v492_v45, %v499_v53 }
  0xfc   : > { %v502_v57 = vshrl.u32 %v484_v27, %v500_v54  ;;  %v505_v58 = vadd.s32 127, %v504_v55 }
  0xfe   : > { %v503_v49 = vor.u32 %v502_v57, %v501_v56  ;;  %v506_v59 = vshll.u32 %v505_v58, 23 }
 0x100   : > { %v507_v60 = vor.u32 4788187, %v506_v59  ;;  %v510_v62 = vcvt.s32.f32 %v503_v49 }
 0x102   : > { %v508_v61 = vand.u32 2147483647, %v507_v60 }
 0x104   : > { %v511_v63 = vmul.f32 %v510_v62, %v508_v61 }
 0x106   : > { %v512_v0 = vxor.u32 2147483648, %v511_v63 }
 0x108   : > { %v513_v1 = vsel %vm392_vm13, %v512_v0, %v511_v63 }
 0x109   : > { %v516_v3 = vsel %vm391_vm14, %v1201_v15, %v513_v1 }
 0x10a   : > { %v518_v4 = vmul.f32 %v516_v3, %v516_v3 }
 0x10c   : > { %v526_v5 = vmul.f32 -0.00019511016, %v518_v4  ;;  %v519_v6 = vmul.f32 -0.001358992, %v518_v4 }
 0x10e   : > { %v527_v8 = vadd.f32 0.008332121, %v526_v5  ;;  %v520_v9 = vadd.f32 0.041655596, %v519_v6 }
 0x110   : > { %v528_v11 = vmul.f32 %v527_v8, %v518_v4  ;;  %v521_v12 = vmul.f32 %v520_v9, %v518_v4 }
 0x112   : > { %v529_v13 = vadd.f32 -0.16666654, %v528_v11  ;;  %v522_v14 = vadd.f32 -0.4999988, %v521_v12 }
 0x114   : > { %v530_v17 = vmul.f32 %v529_v13, %v518_v4  ;;  %v523_v20 = vmul.f32 %v522_v14, %v518_v4 }
 0x116   : > { %v531_v18 = vadd.f32 1.0, %v530_v17  ;;  %v524_v19 = vadd.f32 1.0, %v523_v20 }
 0x118   : > { %v532_v22 = vmul.f32 %v531_v18, %v516_v3  ;;  %v541_v23 = vxor.u32 2147483648, %v524_v19 }
 0x11a   : > { %v538_v24 = vxor.u32 2147483648, %v532_v22  ;;  %v542_v29 = vsel %vm540_vm1, %v541_v23, %v532_v22 }
 0x11c   : > { %v539_v26 = vsel %vm537_vm15, %v524_v19, %v538_v24 }
 0x11d   : > { %v543_v30 = vsel %vm536_vm2, %v539_v26, %v542_v29 }
 0x11e   : > { %v544_v31 = vsel %vm533_vm3, nan, %v543_v30 }
 0x11f   : > { %545 = vst.msk [vmem:[%s335_s12] sm:$0xff] %vm365_vm0, %v544_v31 }
 0x120   : > { %965 = shalt.err (!%p962_p0)
}
 0x121   : > { %733 = dma.vmem_to_hbm [thread:$0]  (%p1149_p2), %s561_s13, 128, %s563_s26, %s547_s21  }
 0x122 PF: > { %s574_s17 = sand.u32 1, %s1008_s18   ;;  %p750_p4 = pnand %p695_p6, %p1156_p5 }
 0x123   : > { %s575_s20 = scalar_lea.sflag [#allocation4], %s574_s17 }
 0x124   : > { %p751_p7 = pneg %p750_p4 }
 0x126   : > { %1003 = dma.done.wait (%p751_p7), %s575_s20, 128  }
 0x127   : > { %1005 = vsyncadd (%p751_p7), %s575_s20, 4294967168  ;;  %s25_s23 = sadd.s32 1, %s1028_s23   ;;  %s1319_s25 = sld [smem:[#allocation15_spill]] }
 0x128   : > { %p22_p8 = scmp.ge.s32.totalorder %s25_s23, 4   ;;  %s1320_s20 = sld [smem:[#allocation17_spill]] }
 0x129   : > { %s1321_s28 = sld [smem:[#allocation16_spill]]  ;;  %s1322_s18 = smov %s1012_s19 }
 0x12a   : > { %s1324_s21 = smov %s1024_s22 }
 0x12b   :  { %24 = sbr.rel (!%p22_p8) target bundleno = 12 (0xc), region = 109 }
 0x12d   : > { %s1323_s19 = smov %s1319_s25 }
 0x12f   : > { %s1325_s22 = smov %s1321_s28 }
 0x130   :  { %581 = vsyncpa [#allocation3], 1 }
 0x131   :  { %583 = vsyncpa [#allocation3 + $0x1], 1 }
 0x132   :  { %584 = vsyncpa [#allocation6], 1 }
 0x133   :  { %585 = vsyncpa [#allocation9], 1 }
 0x134   :  { %587 = vsyncpa [#allocation9 + $0x1], 1 }
 0x135   :  { %588 = vsyncpa [#allocation4], 1 }
 0x136   :  { %590 = vsyncpa [#allocation4 + $0x1], 1 }

</bundles_post_ra>
